<compile_context>
chip_gen: v7x
topology: tpu7x:2x2x1
jax: 0.10.0
libtpu: 0.0.40
codegen_flags: <defaults>
</compile_context>

<pallas_src>
import jax
import jax.numpy as jnp
from jax.experimental import pallas as pl
from jax.experimental.pallas import tpu as pltpu


def _round_up(x, m):
    return (x + m - 1) // m * m


def _linear_bias_kernel(x_ref, w_ref, b_ref, o_ref):
    # Whole reduction in one MXU pass; f32 accumulation via
    # preferred_element_type; bias add + downcast fused into the store.
    o_ref[...] = (
        jnp.dot(x_ref[...], w_ref[...], preferred_element_type=jnp.float32)
        + b_ref[...]
    ).astype(o_ref.dtype)


def linear_pallas(x2d_bf16, w_bf16, b_row_f32, *, out_dtype=jnp.float32):
    """y = x2d @ w + b as one Pallas TPU call with a single K step.

    Expects: x2d_bf16 (M, K) bf16 with M a multiple of 16 (bf16 sublane
    packing granule), w_bf16 (K, C) bf16, b_row_f32 (1, C) f32, K lane-aligned
    (multiple of 128) and small enough to hold whole in VMEM.
    """
    M, K = x2d_bf16.shape
    Kw, C = w_bf16.shape
    assert K == Kw and b_row_f32.shape == (1, C)
    assert M % 16 == 0, "pad batch to the bf16 sublane granule (16) upstream"
    assert K % 128 == 0, "K must be lane-aligned (guaranteed at module init)"
    # TODO(synk): add a K-grid reduction path (f32 VMEM accumulator, K axis
    # 'arbitrary' and last) if K ever exceeds a comfortable single-step VMEM
    # footprint (> 4096 here).
    assert K <= 4096

    tm = min(256, M)
    assert M % tm == 0

    if C <= 128:
        # Tiny head: keep the true last dim (legal: equals the array dim).
        # No output-column padding, no post-call column slice; the masked
        # 10-lane store is cheaper than a padded tile + extra slice kernel.
        tn = C
    else:
        # Larger heads: lane-aligned tiles.  128 matches v5e's MXU column
        # width; 256 feeds v6e/v7x's 256-wide MXU full width.
        assert C % 128 == 0
        tn = 256 if C % 256 == 0 else 128
    grid = (M // tm, C // tn)

    cost = pl.CostEstimate(
        flops=2 * M * K * C,
        transcendentals=0,
        bytes_accessed=M * K * 2 + K * C * 2 + C * 4 + M * C * 4,
    )

    return pl.pallas_call(
        _linear_bias_kernel,
        out_shape=jax.ShapeDtypeStruct((M, C), out_dtype),
        grid_spec=pltpu.PrefetchScalarGridSpec(
            num_scalar_prefetch=0,
            grid=grid,
            in_specs=[
                pl.BlockSpec((tm, K), lambda i, j: (i, 0)),   # activations
                pl.BlockSpec((K, tn), lambda i, j: (0, j)),   # weights
                pl.BlockSpec((1, tn), lambda i, j: (0, j)),   # bias row
            ],
            out_specs=pl.BlockSpec((tm, tn), lambda i, j: (i, j)),
        ),
        compiler_params=pltpu.CompilerParams(
            dimension_semantics=("parallel", "parallel")),
        cost_estimate=cost,
    )(x2d_bf16, w_bf16, b_row_f32)


class LinearClassifier:
    """Inner module: flatten + Linear(in_features -> num_classes).

    Parameters are prepared once at init (bf16 weight for the MXU, f32 bias
    as a (1, C) row) so the per-call path is just reshape + bf16 cast +
    a tiny batch pad + one Pallas call.
    """

    def __init__(self, in_features, num_classes, key):
        assert in_features % 128 == 0
        k_w, k_b = jax.random.split(key)
        scale = 1.0 / jnp.sqrt(jnp.float32(in_features))
        # Deterministic init (uniform, like torch.nn.Linear's default range).
        self.w = jax.random.uniform(
            k_w, (in_features, num_classes), jnp.float32, -scale, scale
        ).astype(jnp.bfloat16)                      # MXU-native, hoisted cast
        self.b = jax.random.uniform(
            k_b, (1, num_classes), jnp.float32, -scale, scale)
        self.in_features = in_features
        self.num_classes = num_classes

    def __call__(self, x):
        n = x.shape[0]
        x2d = x.reshape(n, -1).astype(jnp.bfloat16)     # NCHW -> (N, K)
        n_pad = _round_up(n, 16)                        # bf16 sublane granule
        if n_pad != n:
            x2d = jnp.pad(x2d, ((0, n_pad - n), (0, 0)))
        out = linear_pallas(x2d, self.w, self.b)
        return out[:n] if n_pad != n else out


class WrappedModel:
    """Mirrors the PyTorch WrappedModel: forward(x) = self.module(x)."""

    def __init__(self, module):
        self.module = module

    def __call__(self, x):
        return self.module(x)


if __name__ == "__main__":
    key = jax.random.PRNGKey(0)
    k_x, k_p = jax.random.split(key)

    # Small ImageNet-like input: batch=2, channels=4, spatial=16x16 (NCHW).
    x = jax.random.normal(k_x, (2, 4, 16, 16), dtype=jnp.float32)

    num_classes = 10
    inner = LinearClassifier(in_features=4 * 16 * 16,
                             num_classes=num_classes, key=k_p)
    model = WrappedModel(inner)

    out = jax.block_until_ready(model(x))
    assert out.shape == (2, num_classes)
    assert out.dtype == jnp.float32

    # Tight check: same bf16 inputs, f32 accumulation, in plain XLA.
    x2d_bf16 = x.reshape(x.shape[0], -1).astype(jnp.bfloat16)
    ref = jnp.dot(x2d_bf16, inner.w,
                  preferred_element_type=jnp.float32) + inner.b
    assert jnp.allclose(out, ref, atol=1e-3, rtol=1e-3)

    # Loose check: f32 math on the (bf16-quantized) parameters with f32
    # activations; tolerance covers bf16 activation quantization over K=1024.
    ref_f32 = x.reshape(x.shape[0], -1) @ inner.w.astype(jnp.float32) + inner.b
    assert jnp.allclose(out, ref_f32, atol=5e-2, rtol=5e-2)

    print("KERNEL_OK")
</pallas_src>

<mosaic_0001>
module attributes {stable_mosaic.version = 11 : i64} {
  func.func @_linear_bias_kernel(%arg0: i32, %arg1: i32, %arg2: memref<16x1024xbf16, #tpu.memory_space<vmem>>, %arg3: memref<1024x10xbf16, #tpu.memory_space<vmem>>, %arg4: memref<1x10xf32, #tpu.memory_space<vmem>>, %arg5: memref<16x10xf32, #tpu.memory_space<vmem>>) attributes {dimension_semantics = [#tpu.dimension_semantics<parallel>, #tpu.dimension_semantics<parallel>], iteration_bounds = array<i64: 1, 1>, scalar_prefetch = 0 : i64, scratch_operands = 0 : i64, tpu.core_type = #tpu.core_type<tc>, window_params = [{transform_indices = @transform_0, window_bounds = array<i64: 16, 1024>}, {transform_indices = @transform_1, window_bounds = array<i64: 1024, 10>}, {transform_indices = @transform_2, window_bounds = array<i64: 1, 10>}, {transform_indices = @transform_3, window_bounds = array<i64: 16, 10>}]} {
    %c0 = arith.constant 0 : index
    %c0_0 = arith.constant 0 : index
    %0 = vector.load %arg2[%c0, %c0_0] : memref<16x1024xbf16, #tpu.memory_space<vmem>>, vector<16x1024xbf16>
    %c0_1 = arith.constant 0 : index
    %c0_2 = arith.constant 0 : index
    %1 = vector.load %arg3[%c0_1, %c0_2] : memref<1024x10xbf16, #tpu.memory_space<vmem>>, vector<1024x10xbf16>
    %cst = arith.constant dense<0.000000e+00> : vector<16x10xf32>
    %2 = tpu.matmul %0, %1, %cst {dimension_numbers = #tpu.dot_dimension_numbers<[1], [0], [0], [1], [0, 0, 1, 1], [], []>} : vector<16x1024xbf16>, vector<1024x10xbf16>, vector<16x10xf32> -> vector<16x10xf32>
    %c0_3 = arith.constant 0 : index
    %c0_4 = arith.constant 0 : index
    %3 = vector.load %arg4[%c0_3, %c0_4] : memref<1x10xf32, #tpu.memory_space<vmem>>, vector<1x10xf32>
    %4 = vector.broadcast %3 : vector<1x10xf32> to vector<16x10xf32>
    %5 = arith.addf %2, %4 : vector<16x10xf32>
    %c0_5 = arith.constant 0 : index
    %c0_6 = arith.constant 0 : index
    %6 = vector.load %arg5[%c0_5, %c0_6] : memref<16x10xf32, #tpu.memory_space<vmem>>, vector<16x10xf32>
    tpu.vector_store %arg5[%c0_5, %c0_6], %5 {strides = array<i32>} : memref<16x10xf32, #tpu.memory_space<vmem>>, vector<16x10xf32>,
    return
  }
  func.func @transform_0(%arg0: i32, %arg1: i32) -> (i32, i32) {
    %c0_i32 = arith.constant 0 : i32
    %c0_i32_0 = arith.constant 0 : i32
    return %arg0, %c0_i32 : i32, i32
  }
  func.func @transform_1(%arg0: i32, %arg1: i32) -> (i32, i32) {
    %c0_i32 = arith.constant 0 : i32
    %c0_i32_0 = arith.constant 0 : i32
    return %c0_i32, %arg1 : i32, i32
  }
  func.func @transform_2(%arg0: i32, %arg1: i32) -> (i32, i32) {
    %c0_i32 = arith.constant 0 : i32
    %c0_i32_0 = arith.constant 0 : i32
    return %c0_i32, %arg1 : i32, i32
  }
  func.func @transform_3(%arg0: i32, %arg1: i32) -> (i32, i32) {
    %c0_i32 = arith.constant 0 : i32
    return %arg0, %arg1 : i32, i32
  }
}

</mosaic_0001>

<bundles_post_ra>
// kernel: tpu_custom_call.1
= control target key start
LH: loop header
LB: loop body
LE: loop exit
PB: predicated region body
PF: predicated region fallthrough
CT: control target
= control target key end

     0   :  { %s1272_s0 = inlined_call_operand.vmem [shape: bf16[16,1024], index: 0, kind: input, shape index: {}]   ;;  %s1273_s1 = inlined_call_operand.vmem [shape: bf16[1024,10], index: 1, kind: input, shape index: {}]   ;;  %s1274_s2 = inlined_call_operand.vmem [shape: f32[1,10], index: 2, kind: input, shape index: {}]   ;;  %s1275_s3 = inlined_call_operand.hbm [shape: f32[16,10], index: 3, kind: output, shape index: {}]  }
   0x1   :  { %v930_v0 = vld [vmem:[%s1273_s1 + $0x40] sm:$0xff]   ;;  %v934_v4 = vld [vmem:[%s1273_s1 + $0x48] sm:$0xff]   ;;  %v938_v8 = vld [vmem:[%s1273_s1 + $0x50] sm:$0xff]  }
   0x2   :  { %v931_v1 = vld [vmem:[%s1273_s1 + $0xc0] sm:$0xff]   ;;  %839 = vmatprep.subr.bf16.mxu0 %v930_v0  ;;  %v935_v5 = vld [vmem:[%s1273_s1 + $0xc8] sm:$0xff]   ;;  %v939_v9 = vld [vmem:[%s1273_s1 + $0xd0] sm:$0xff]  }
   0x3   :  { %v932_v2 = vld [vmem:[%s1273_s1] sm:$0xff]   ;;  %861 = vmatprep.subr.bf16.mxu1 %v931_v1  ;;  %v936_v6 = vld [vmem:[%s1273_s1 + $0x8] sm:$0xff]   ;;  %v940_v10 = vld [vmem:[%s1273_s1 + $0x10] sm:$0xff]  }
   0x4   :  { %v933_v3 = vld [vmem:[%s1273_s1 + $0x80] sm:$0xff]   ;;  %840 = vmatpush3.bf16.msra.mxu0 %v932_v2  ;;  %v937_v7 = vld [vmem:[%s1273_s1 + $0x88] sm:$0xff]   ;;  %v941_v11 = vld [vmem:[%s1273_s1 + $0x90] sm:$0xff]  }
   0x5   :  { %862 = vmatpush3.bf16.msra.mxu1 %v933_v3  ;;  %841 = vmatprep.subr.bf16.mxu0 %v934_v4  ;;  %v942_v12 = vld [vmem:[%s1273_s1 + $0x58] sm:$0xff]   ;;  %v946_v16 = vld [vmem:[%s1273_s1 + $0x60] sm:$0xff]   ;;  %v950_v20 = vld [vmem:[%s1273_s1 + $0x68] sm:$0xff]  }
   0x6   :  { %863 = vmatprep.subr.bf16.mxu1 %v935_v5  ;;  %v943_v13 = vld [vmem:[%s1273_s1 + $0xd8] sm:$0xff]   ;;  %v947_v17 = vld [vmem:[%s1273_s1 + $0xe0] sm:$0xff]   ;;  %v951_v21 = vld [vmem:[%s1273_s1 + $0xe8] sm:$0xff]  }
   0x7   :  { %v944_v14 = vld [vmem:[%s1273_s1 + $0x18] sm:$0xff]   ;;  %v948_v18 = vld [vmem:[%s1273_s1 + $0x20] sm:$0xff]   ;;  %v952_v22 = vld [vmem:[%s1273_s1 + $0x28] sm:$0xff]  }
   0x8   :  { %842 = vmatpush3.bf16.msra.mxu0 %v936_v6  ;;  %v945_v15 = vld [vmem:[%s1273_s1 + $0x98] sm:$0xff]   ;;  %v949_v19 = vld [vmem:[%s1273_s1 + $0xa0] sm:$0xff]   ;;  %v953_v23 = vld [vmem:[%s1273_s1 + $0xa8] sm:$0xff]  }
   0x9   :  { %864 = vmatpush3.bf16.msra.mxu1 %v937_v7  ;;  %843 = vmatprep.subr.bf16.mxu0 %v938_v8  ;;  %v954_v24 = vld [vmem:[%s1273_s1 + $0x70] sm:$0xff]   ;;  %v958_v28 = vld [vmem:[%s1273_s1 + $0x78] sm:$0xff]   ;;  %v16_v32 = vld [vmem:[%s1272_s0] sm:$0xff] }
   0xa   :  { %865 = vmatprep.subr.bf16.mxu1 %v939_v9  ;;  %v955_v25 = vld [vmem:[%s1273_s1 + $0xf0] sm:$0xff]   ;;  %v959_v29 = vld [vmem:[%s1273_s1 + $0xf8] sm:$0xff]   ;;  %v20_v33 = vld [vmem:[%s1272_s0 + $0x20] sm:$0xff] }
   0xb   :  { %v956_v26 = vld [vmem:[%s1273_s1 + $0x30] sm:$0xff]   ;;  %v960_v30 = vld [vmem:[%s1273_s1 + $0x38] sm:$0xff]   ;;  %v17_v34 = vld [vmem:[%s1272_s0 + $0x8] sm:$0xff]  ;;  %v767_v35 = vcombine.low %v16_v32, %v20_v33  ;;  %v768_v36 = vcombine.high %v16_v32, %v20_v33 }
   0xc   :  { %844 = vmatpush3.bf16.msra.mxu0 %v940_v10  ;;  %v957_v27 = vld [vmem:[%s1273_s1 + $0xb0] sm:$0xff]   ;;  %v961_v31 = vld [vmem:[%s1273_s1 + $0xb8] sm:$0xff]   ;;  %v21_v37 = vld [vmem:[%s1272_s0 + $0x28] sm:$0xff] }
   0xd   :  { %866 = vmatpush3.bf16.msra.mxu1 %v941_v11  ;;  %845 = vmatprep.subr.bf16.mxu0 %v942_v12  ;;  %v769_v38 = vcombine.low %v17_v34, %v21_v37  ;;  %v770_v39 = vcombine.high %v17_v34, %v21_v37  ;;  %v962_v40 = vld [vmem:[%s1273_s1 + $0x140] sm:$0xff]   ;;  %v966_v44 = vld [vmem:[%s1273_s1 + $0x148] sm:$0xff]   ;;  %v970_v48 = vld [vmem:[%s1273_s1 + $0x150] sm:$0xff]  }
   0xe   :  { %867 = vmatprep.subr.bf16.mxu1 %v943_v13  ;;  %615 = vmatprep.mubr.bf16.mxu0 %v768_v36  ;;  %v963_v41 = vld [vmem:[%s1273_s1 + $0x1c0] sm:$0xff]   ;;  %v967_v45 = vld [vmem:[%s1273_s1 + $0x1c8] sm:$0xff]   ;;  %v971_v49 = vld [vmem:[%s1273_s1 + $0x1d0] sm:$0xff]  }
   0xf   :  { %656 = vmatprep.mubr.bf16.mxu1 %v770_v39  ;;  %v964_v42 = vld [vmem:[%s1273_s1 + $0x100] sm:$0xff]   ;;  %v968_v46 = vld [vmem:[%s1273_s1 + $0x108] sm:$0xff]   ;;  %v972_v50 = vld [vmem:[%s1273_s1 + $0x110] sm:$0xff]  }
  0x10   :  { %846 = vmatpush3.bf16.msra.mxu0 %v944_v14  ;;  %v965_v43 = vld [vmem:[%s1273_s1 + $0x180] sm:$0xff]   ;;  %v969_v47 = vld [vmem:[%s1273_s1 + $0x188] sm:$0xff]   ;;  %v973_v51 = vld [vmem:[%s1273_s1 + $0x190] sm:$0xff]  }
  0x11   :  { %868 = vmatpush3.bf16.msra.mxu1 %v945_v15  ;;  %847 = vmatprep.subr.bf16.mxu0 %v946_v16  ;;  %v974_v52 = vld [vmem:[%s1273_s1 + $0x158] sm:$0xff]   ;;  %v978_v56 = vld [vmem:[%s1273_s1 + $0x160] sm:$0xff]   ;;  %v982_v60 = vld [vmem:[%s1273_s1 + $0x168] sm:$0xff]  }
  0x12   :  { %869 = vmatprep.subr.bf16.mxu1 %v947_v17  ;;  %v975_v53 = vld [vmem:[%s1273_s1 + $0x1d8] sm:$0xff]   ;;  %v979_v57 = vld [vmem:[%s1273_s1 + $0x1e0] sm:$0xff]   ;;  %v983_v61 = vld [vmem:[%s1273_s1 + $0x1e8] sm:$0xff]  }
  0x13   :  { %v976_v54 = vld [vmem:[%s1273_s1 + $0x118] sm:$0xff]   ;;  %v980_v58 = vld [vmem:[%s1273_s1 + $0x120] sm:$0xff]   ;;  %v984_v62 = vld [vmem:[%s1273_s1 + $0x128] sm:$0xff]  }
  0x14   :  { %848 = vmatpush3.bf16.msra.mxu0 %v948_v18  ;;  %v977_v55 = vld [vmem:[%s1273_s1 + $0x198] sm:$0xff]   ;;  %v981_v59 = vld [vmem:[%s1273_s1 + $0x1a0] sm:$0xff]   ;;  %v985_v63 = vld [vmem:[%s1273_s1 + $0x1a8] sm:$0xff]  }
  0x15   :  { %870 = vmatpush3.bf16.msra.mxu1 %v949_v19  ;;  %849 = vmatprep.subr.bf16.mxu0 %v950_v20  ;;  %v986_v0 = vld [vmem:[%s1273_s1 + $0x170] sm:$0xff]   ;;  %v990_v4 = vld [vmem:[%s1273_s1 + $0x178] sm:$0xff]  }
  0x16   :  { %871 = vmatprep.subr.bf16.mxu1 %v951_v21  ;;  %v987_v1 = vld [vmem:[%s1273_s1 + $0x1f0] sm:$0xff]   ;;  %v991_v5 = vld [vmem:[%s1273_s1 + $0x1f8] sm:$0xff]  }
  0x17   :  { %v988_v2 = vld [vmem:[%s1273_s1 + $0x130] sm:$0xff]   ;;  %v992_v6 = vld [vmem:[%s1273_s1 + $0x138] sm:$0xff]  }
  0x18   :  { %850 = vmatpush3.bf16.msra.mxu0 %v952_v22  ;;  %v989_v3 = vld [vmem:[%s1273_s1 + $0x1b0] sm:$0xff]   ;;  %v993_v7 = vld [vmem:[%s1273_s1 + $0x1b8] sm:$0xff]  }
  0x19   :  { %872 = vmatpush3.bf16.msra.mxu1 %v953_v23  ;;  %851 = vmatprep.subr.bf16.mxu0 %v954_v24  ;;  %v18_v8 = vld [vmem:[%s1272_s0 + $0x10] sm:$0xff]  ;;  %v19_v12 = vld [vmem:[%s1272_s0 + $0x18] sm:$0xff] }
  0x1a   :  { %873 = vmatprep.subr.bf16.mxu1 %v955_v25  ;;  %v22_v9 = vld [vmem:[%s1272_s0 + $0x30] sm:$0xff]  ;;  %v23_v13 = vld [vmem:[%s1272_s0 + $0x38] sm:$0xff] }
  0x1b   :  { %v771_v10 = vcombine.low %v18_v8, %v22_v9  ;;  %v772_v11 = vcombine.high %v18_v8, %v22_v9 }
  0x1c   :  { %852 = vmatpush3.bf16.msra.mxu0 %v956_v26 }
  0x1d   :  { %874 = vmatpush3.bf16.msra.mxu1 %v957_v27  ;;  %853 = vmatprep.subr.bf16.mxu0 %v958_v28 }
  0x1e   :  { %875 = vmatprep.subr.bf16.mxu1 %v959_v29 }
  0x20   :  { %854 = vmatpush3.bf16.msra.mxu0 %v960_v30 }
  0x21   :  { %876 = vmatpush3.bf16.msra.mxu1 %v961_v31  ;;  %883 = vmatprep.subr.bf16.mxu0 %v962_v40 }
  0x22   :  { %905 = vmatprep.subr.bf16.mxu1 %v963_v41 }
  0x23   :  { %616 = vmatmul.mubr.bf16.vlgmr.msra.gmra.mrb[0].mxu0 %v767_v35 }
  0x24   :  { %657 = vmatmul.mubr.bf16.vlgmr.msra.gmra.mrb[0].mxu1 %v769_v38  ;;  %884 = vmatpush3.bf16.msra.mxu0 %v964_v42 }
  0x25   :  { %906 = vmatpush3.bf16.msra.mxu1 %v965_v43  ;;  %885 = vmatprep.subr.bf16.mxu0 %v966_v44 }
  0x26   :  { %907 = vmatprep.subr.bf16.mxu1 %v967_v45 }
  0x28   :  { %886 = vmatpush3.bf16.msra.mxu0 %v968_v46 }
  0x29   :  { %908 = vmatpush3.bf16.msra.mxu1 %v969_v47  ;;  %887 = vmatprep.subr.bf16.mxu0 %v970_v48 }
  0x2a   :  { %909 = vmatprep.subr.bf16.mxu1 %v971_v49 }
  0x2c   :  { %888 = vmatpush3.bf16.msra.mxu0 %v972_v50 }
  0x2d   :  { %910 = vmatpush3.bf16.msra.mxu1 %v973_v51  ;;  %889 = vmatprep.subr.bf16.mxu0 %v974_v52 }
  0x2e   :  { %911 = vmatprep.subr.bf16.mxu1 %v975_v53 }
  0x30   :  { %890 = vmatpush3.bf16.msra.mxu0 %v976_v54 }
  0x31   :  { %912 = vmatpush3.bf16.msra.mxu1 %v977_v55  ;;  %891 = vmatprep.subr.bf16.mxu0 %v978_v56 }
  0x32   :  { %913 = vmatprep.subr.bf16.mxu1 %v979_v57 }
  0x34   :  { %892 = vmatpush3.bf16.msra.mxu0 %v980_v58 }
  0x35   :  { %914 = vmatpush3.bf16.msra.mxu1 %v981_v59  ;;  %893 = vmatprep.subr.bf16.mxu0 %v982_v60 }
  0x36   :  { %915 = vmatprep.subr.bf16.mxu1 %v983_v61 }
  0x38   :  { %894 = vmatpush3.bf16.msra.mxu0 %v984_v62 }
  0x39   :  { %916 = vmatpush3.bf16.msra.mxu1 %v985_v63  ;;  %895 = vmatprep.subr.bf16.mxu0 %v986_v0 }
  0x3a   :  { %917 = vmatprep.subr.bf16.mxu1 %v987_v1 }
  0x3c   :  { %896 = vmatpush3.bf16.msra.mxu0 %v988_v2 }
  0x3d   :  { %918 = vmatpush3.bf16.msra.mxu1 %v989_v3  ;;  %897 = vmatprep.subr.bf16.mxu0 %v990_v4 }
  0x3e   :  { %919 = vmatprep.subr.bf16.mxu1 %v991_v5 }
  0x40   :  { %898 = vmatpush3.bf16.msra.mxu0 %v992_v6 }
  0x41   :  { %8 = vsyncpa [#allocation3], 0  ;;  %920 = vmatpush3.bf16.msra.mxu1 %v993_v7  ;;  %v773_v14 = vcombine.low %v19_v12, %v23_v13  ;;  %v774_v15 = vcombine.high %v19_v12, %v23_v13  ;;  %697 = vmatprep.mubr.bf16.mxu0 %v772_v11  ;;  %v766_v18 = vld [vmem:[%s1274_s2] ss:$0 sm:$0xff]  ;;  %vm747_vm0 = vcmask 80896   ;;  %s1018_s0 = smov [#allocation2]  }
  0x42   :  { %s755_s2 = sshll.u32 %s1018_s0, 4  ;;  %s756_s2 = int_to_ptr.vmem [resolvable:$true] %s755_s2 }
  0x43   :  { %738 = vmatprep.mubr.bf16.mxu1 %v774_v15  ;;  %698 = vmatmul.mubr.bf16.vlgmr.msra.gmra.mrb[4].mxu0 %v771_v10  ;;  %s994_s22 = scalar_lea.vmem %s756_s2, 256  ;;  %p999_p1 = scmp.lt.s32.totalorder %s756_s2, %s756_s2 }
  0x44   :  { %739 = vmatmul.mubr.bf16.vlgmr.msra.gmra.mrb[4].mxu1 %v773_v14  ;;  %p995_p0 = scmp.ne.s32.totalorder %s756_s2, %s994_s22  ;;  %p1000_p2 = scmp.lt.s32.totalorder %s994_s22, %s994_s22 }
  0x46   :  { %p1001_p3 = por %p1000_p2, %p999_p1 }
  0x48   :  { %p1002_p4 = pnand %p1001_p3, %p995_p0 }
  0xf6   :  { %v855_v16 = vpop.f32.mrb[0].mxu0 }
  0xf7   :  { %v877_v17 = vpop.f32.mrb[0].mxu1  ;;  %v856_v19 = vpop.f32.mrb[1].mxu0 }
  0xf8   :  { %v857_v20 = vadd.f32 %v856_v19, %v855_v16  ;;  %v878_v21 = vpop.f32.mrb[1].mxu1  ;;  %v858_v22 = vpop.f32.mrb[2].mxu0 }
  0xf9   :  { %v879_v23 = vadd.f32 %v878_v21, %v877_v17  ;;  %v880_v24 = vpop.f32.mrb[2].mxu1  ;;  %v859_v25 = vpop.f32.mrb[3].mxu0 }
  0xfa   :  { %v618_v26 = vadd.f32 %v857_v20, %v766_v18  ;;  %v860_v27 = vadd.f32 %v859_v25, %v858_v22  ;;  %v881_v28 = vpop.f32.mrb[3].mxu1 }
  0xfb   :  { %v882_v29 = vadd.f32 %v881_v28, %v880_v24 }
  0xfc   :  { %v659_v30 = vadd.f32 %v879_v23, %v618_v26  ;;  %v621_v31 = vadd.f32 %v860_v27, %v766_v18 }
  0xfe   :  { %v662_v32 = vadd.f32 %v882_v29, %v621_v31 }
 0x116   :  { %v899_v33 = vpop.f32.mrb[4].mxu0 }
 0x117   :  { %v921_v34 = vpop.f32.mrb[4].mxu1  ;;  %v900_v35 = vpop.f32.mrb[5].mxu0 }
 0x118   :  { %v901_v36 = vadd.f32 %v900_v35, %v899_v33  ;;  %v922_v37 = vpop.f32.mrb[5].mxu1  ;;  %v902_v38 = vpop.f32.mrb[6].mxu0 }
 0x119   :  { %v923_v39 = vadd.f32 %v922_v37, %v921_v34  ;;  %v924_v40 = vpop.f32.mrb[6].mxu1  ;;  %v903_v41 = vpop.f32.mrb[7].mxu0 }
 0x11a   :  { %v700_v42 = vadd.f32 %v901_v36, %v659_v30  ;;  %v904_v43 = vadd.f32 %v903_v41, %v902_v38  ;;  %v925_v44 = vpop.f32.mrb[7].mxu1 }
 0x11b   :  { %v926_v45 = vadd.f32 %v925_v44, %v924_v40 }
 0x11c   :  { %v741_v46 = vadd.f32 %v923_v39, %v700_v42  ;;  %v703_v47 = vadd.f32 %v904_v43, %v662_v32 }
 0x11e   :  { %748 = vst.msk [vmem:[#allocation2] sm:$0xff] %vm747_vm0, %v741_v46  ;;  %v744_v48 = vadd.f32 %v926_v45, %v703_v47 }
 0x120   :  { %749 = vst.msk [vmem:[#allocation2 + $0x8] sm:$0xff] %vm747_vm0, %v744_v48 }
 0x121   :  { %1005 = shalt.err (!%p1002_p4)
}
 0x122   :  { %s1006_s25 = scalar_lea.hbm %s1275_s3, 256 }
 0x123   :  { %p1007_p5 = scmp.ne.s32.totalorder %s1275_s3, %s1006_s25  ;;  %p1010_p6 = scmp.lt.u32.totalorder %s1006_s25, %s1275_s3 }
 0x125   :  { %p1012_p7 = pnand %p1010_p6, %p1007_p5 }
 0x127   :  { %1015 = shalt.err (!%p1012_p7)
}
 0x128   :  { %s1019_s30 = smov 128   ;;  %s1020_s4 = smov 8  }
 0x129   :  { %761 = dma.vmem_to_hbm [thread:$0]  %s756_s2, 256, %s1275_s3, [#allocation3], %s1019_s30, %s1019_s30, %s1020_s4  }
 0x12a   :  { %1016 = dma.done.wait [#allocation3], 256  }
 0x12b   :  { %1017 = vsyncadd [#allocation3], 4294967040 }
 0x12c   :  { %765 = vsyncpa [#allocation3], 1 }

</bundles_post_ra>
